<compile_context>
chip_gen: v7x
topology: tpu7x:2x2x1
jax: 0.10.0
libtpu: 0.0.40
codegen_flags: <defaults>
</compile_context>

<pallas_src>
from functools import partial

import numpy as np
import jax
import jax.numpy as jnp
from jax.experimental import pallas as pl
from jax.experimental.pallas import tpu as pltpu


# ----------------------------- Pallas kernel --------------------------------
def euler_fused_kernel(coefs_ref, x_ref, w1_ref, bt_ref, w2_ref, b2_ref, out_ref):
    # coefs_ref : SMEM f32[2*steps]  -> [a_0, binv_0, a_1, binv_1, ...] in reversed-step order
    #             a_s = sqrt(beta[t_prev_s]),  binv_s = 1/sqrt(1 - beta[t_s])
    # x_ref     : VMEM (Bp, D) f32      initial x (read once, at s == 0)
    # w1_ref    : VMEM (D, H)  bf16     resident across all steps
    # bt_ref    : VMEM (steps, H) f32   precomputed b1 + temb[t_s], resident
    # w2_ref    : VMEM (H, D)  bf16     resident across all steps
    # b2_ref    : VMEM (1, D)  f32      resident
    # out_ref   : VMEM (Bp, D) f32      carried accumulator (same block every step)
    s = pl.program_id(0)

    @pl.when(s == 0)
    def _():
        out_ref[...] = x_ref[...]

    x = out_ref[...]                                    # (Bp, D) f32, carried state
    bt = bt_ref[pl.ds(s, 1), :]                         # (1, H) = b1 + temb[t_s]

    h = jnp.tanh(
        jnp.dot(x.astype(jnp.bfloat16), w1_ref[...],
                preferred_element_type=jnp.float32) + bt
    )
    eps = jnp.dot(h.astype(jnp.bfloat16), w2_ref[...],
                  preferred_element_type=jnp.float32) + b2_ref[...]

    a = coefs_ref[2 * s]          # sqrt(beta_t[t_minus_one])
    binv = coefs_ref[2 * s + 1]   # 1 / sqrt(1 - beta_t[t])
    # x -= sqrt(beta[t-1]) * eps ;  x /= sqrt(1 - beta[t])
    out_ref[...] = (x - a * eps) * binv
    # TODO(synk): ancestral=True branch (x += sqrt(beta[t]) * randn_like(x)) not
    # implemented; default ancestral=False path is reproduced exactly.


@partial(jax.jit, static_argnames=("steps",))
def _euler_run(x2d, coefs, w1_bf, bt, w2_bf, b2, steps):
    B, D = x2d.shape
    HIDDEN = w1_bf.shape[1]

    # Pad batch/M up to the f32 sublane multiple (8) to avoid masked partial ops.
    SUBLANE = 8
    Bp = max(SUBLANE, ((B + SUBLANE - 1) // SUBLANE) * SUBLANE)
    x_pad = jnp.zeros((Bp, D), jnp.float32).at[:B, :].set(x2d)

    flops = int(steps * 4 * Bp * D * HIDDEN)                       # 2 matmuls/step
    bytes_accessed = int(w1_bf.size * 2 + w2_bf.size * 2           # bf16 weights, loaded once
                         + 2 * Bp * D * 4                          # x in + x out
                         + bt.size * 4 + b2.size * 4)

    out = pl.pallas_call(
        euler_fused_kernel,
        out_shape=jax.ShapeDtypeStruct((Bp, D), jnp.float32),
        grid_spec=pltpu.PrefetchScalarGridSpec(
            num_scalar_prefetch=0,
            grid=(steps,),
            in_specs=[
                pl.BlockSpec(memory_space=pltpu.MemorySpace.SMEM),    # coefs
                pl.BlockSpec((Bp, D), lambda s: (0, 0)),              # x (read once)
                pl.BlockSpec((D, HIDDEN), lambda s: (0, 0)),          # W1 (resident)
                pl.BlockSpec((steps, HIDDEN), lambda s: (0, 0)),      # b1+temb table (resident)
                pl.BlockSpec((HIDDEN, D), lambda s: (0, 0)),          # W2 (resident)
                pl.BlockSpec((1, D), lambda s: (0, 0)),               # b2 (resident)
            ],
            out_specs=pl.BlockSpec((Bp, D), lambda s: (0, 0)),        # carried x
        ),
        input_output_aliases={1: 0},                                  # update x in place
        compiler_params=pltpu.CompilerParams(
            dimension_semantics=("arbitrary",)),                      # sequential step chain
        cost_estimate=pl.CostEstimate(
            flops=flops,
            transcendentals=int(steps * Bp * HIDDEN),
            bytes_accessed=bytes_accessed),
    )(coefs, x_pad, w1_bf, bt, w2_bf, b2)
    return out[:B]


# ----------------------------- sampler wrapper -------------------------------
def linear_beta_schedule(timesteps, betas=None):
    lo, hi = betas if betas is not None else (1e-4, 2e-2)
    return jnp.linspace(lo, hi, timesteps, dtype=jnp.float32)


def euler_sample(x_nchw, beta_t, model_params, steps=4):
    """Reproduces EulerSampler.forward(x_t, steps) with ancestral=False,
    with all steps fused into a single Pallas kernel."""
    B, C, H, W = x_nchw.shape
    D = C * H * W
    T = int(beta_t.shape[0])
    assert T % steps == 0, "range(0, T, T // steps) yields exactly `steps` entries only if T % steps == 0"

    w1, b1, w2, b2, temb = model_params

    time_steps = np.asarray(list(range(0, T, T // steps)))
    time_steps_prev = np.concatenate([[0], time_steps[:-1]])
    ts_rev = np.ascontiguousarray(time_steps[::-1])           # reversed iteration order
    ts_prev_rev = np.ascontiguousarray(time_steps_prev[::-1])

    beta_np = np.asarray(beta_t)
    a = np.sqrt(beta_np[ts_prev_rev])                         # extract(beta_t, t-1)
    binv = 1.0 / np.sqrt(1.0 - beta_np[ts_rev])               # 1/sqrt(1 - extract(beta_t, t))
    coefs = jnp.asarray(np.stack([a, binv], axis=1).reshape(-1), dtype=jnp.float32)  # (2*steps,)

    # Hoisted per-step additive term: b1 + temb[t_s], all steps at once.
    bt = (b1 + temb[jnp.asarray(ts_rev)]).astype(jnp.float32)  # (steps, HIDDEN)

    w1_bf = w1.astype(jnp.bfloat16)
    w2_bf = w2.astype(jnp.bfloat16)
    b2_f = b2.astype(jnp.float32)

    x2d = x_nchw.reshape(B, D).astype(jnp.float32)
    out2d = _euler_run(x2d, coefs, w1_bf, bt, w2_bf, b2_f, steps)
    return out2d.reshape(B, C, H, W)


def euler_sample_reference(x_nchw, beta_t, model_params, steps=4):
    """Pure-JAX reference with identical (bf16-weight, f32-accum) math."""
    B, C, H, W = x_nchw.shape
    D = C * H * W
    T = int(beta_t.shape[0])
    w1, b1, w2, b2, temb = model_params
    w1_bf = w1.astype(jnp.bfloat16)
    w2_bf = w2.astype(jnp.bfloat16)

    time_steps = np.asarray(list(range(0, T, T // steps)))
    time_steps_prev = np.concatenate([[0], time_steps[:-1]])
    beta_np = np.asarray(beta_t)

    x = x_nchw.reshape(B, D).astype(jnp.float32)
    for t, tp in zip(reversed(time_steps), reversed(time_steps_prev)):
        h = jnp.tanh(jnp.dot(x.astype(jnp.bfloat16), w1_bf,
                             preferred_element_type=jnp.float32) + b1 + temb[t][None, :])
        eps = jnp.dot(h.astype(jnp.bfloat16), w2_bf,
                      preferred_element_type=jnp.float32) + b2
        a = np.sqrt(beta_np[tp])
        binv = 1.0 / np.sqrt(1.0 - beta_np[t])
        x = (x - a * eps) * binv
    return x.reshape(B, C, H, W)


# ---------------------------------- main -------------------------------------
if __name__ == "__main__":
    key = jax.random.PRNGKey(0)
    kx, k1, k2, kt = jax.random.split(key, 4)

    # small shapes consistent with the module's forward (NCHW image, T timesteps)
    B, C, Hs, Ws = 2, 4, 16, 16
    T = 100
    STEPS = 4
    D = C * Hs * Ws      # 1024
    HIDDEN = 128

    x_t = jax.random.normal(kx, (B, C, Hs, Ws), dtype=jnp.float32)

    # deterministic synthetic epsilon-model parameters
    w1 = 0.02 * jax.random.normal(k1, (D, HIDDEN), dtype=jnp.float32)
    b1 = jnp.zeros((1, HIDDEN), dtype=jnp.float32)
    w2 = 0.02 * jax.random.normal(k2, (HIDDEN, D), dtype=jnp.float32)
    b2 = jnp.zeros((1, D), dtype=jnp.float32)
    temb = 0.1 * jax.random.normal(kt, (T, HIDDEN), dtype=jnp.float32)

    beta_t = linear_beta_schedule(T)
    params = (w1, b1, w2, b2, temb)

    out = euler_sample(x_t, beta_t, params, steps=STEPS)
    out = jax.block_until_ready(out)

    ref = jax.block_until_ready(euler_sample_reference(x_t, beta_t, params, steps=STEPS))

    assert out.shape == (B, C, Hs, Ws) and out.dtype == jnp.float32
    assert bool(jnp.all(jnp.isfinite(out)))
    assert bool(jnp.allclose(out, ref, rtol=1e-2, atol=1e-2)), float(jnp.max(jnp.abs(out - ref)))
    print("KERNEL_OK")
</pallas_src>

<mosaic_0001>
module attributes {stable_mosaic.version = 11 : i64} {
  func.func @euler_fused_kernel(%arg0: i32, %arg1: memref<8xf32, #tpu.memory_space<smem>>, %arg2: memref<8x1024xf32, #tpu.memory_space<vmem>>, %arg3: memref<1024x128xbf16, #tpu.memory_space<vmem>>, %arg4: memref<4x128xf32, #tpu.memory_space<vmem>>, %arg5: memref<128x1024xbf16, #tpu.memory_space<vmem>>, %arg6: memref<1x1024xf32, #tpu.memory_space<vmem>>, %arg7: memref<8x1024xf32, #tpu.memory_space<vmem>>) attributes {dimension_semantics = [#tpu.dimension_semantics<arbitrary>], iteration_bounds = array<i64: 4>, scalar_prefetch = 0 : i64, scratch_operands = 0 : i64, tpu.core_type = #tpu.core_type<tc>, window_params = [{transform_indices = @transform_0, window_bounds = array<i64: 8>}, {pipeline_mode = #tpu.pipeline_mode<synchronous>, transform_indices = @transform_1, window_bounds = array<i64: 8, 1024>}, {pipeline_mode = #tpu.pipeline_mode<synchronous>, transform_indices = @transform_2, window_bounds = array<i64: 1024, 128>}, {pipeline_mode = #tpu.pipeline_mode<synchronous>, transform_indices = @transform_3, window_bounds = array<i64: 4, 128>}, {pipeline_mode = #tpu.pipeline_mode<synchronous>, transform_indices = @transform_4, window_bounds = array<i64: 128, 1024>}, {pipeline_mode = #tpu.pipeline_mode<synchronous>, transform_indices = @transform_5, window_bounds = array<i64: 1, 1024>}, {pipeline_mode = #tpu.pipeline_mode<synchronous>, transform_indices = @transform_6, window_bounds = array<i64: 8, 1024>}]} {
    %c0_i32 = arith.constant 0 : i32
    %0 = arith.cmpi eq, %arg0, %c0_i32 : i32
    %1 = arith.extui %0 : i1 to i32
    %c0_i32_0 = arith.constant 0 : i32
    %2 = arith.cmpi ne, %1, %c0_i32_0 : i32
    scf.if %2 {
      %c0_13 = arith.constant 0 : index
      %c0_14 = arith.constant 0 : index
      %31 = vector.load %arg2[%c0_13, %c0_14] : memref<8x1024xf32, #tpu.memory_space<vmem>>, vector<8x1024xf32>
      %c0_15 = arith.constant 0 : index
      %c0_16 = arith.constant 0 : index
      %32 = vector.load %arg7[%c0_15, %c0_16] : memref<8x1024xf32, #tpu.memory_space<vmem>>, vector<8x1024xf32>
      tpu.vector_store %arg7[%c0_15, %c0_16], %31 {strides = array<i32>} : memref<8x1024xf32, #tpu.memory_space<vmem>>, vector<8x1024xf32>,
    } else {
    }
    %c0 = arith.constant 0 : index
    %c0_1 = arith.constant 0 : index
    %3 = vector.load %arg7[%c0, %c0_1] : memref<8x1024xf32, #tpu.memory_space<vmem>>, vector<8x1024xf32>
    %4 = arith.index_cast %arg0 : i32 to index
    %c0_2 = arith.constant 0 : index
    %5 = vector.load %arg4[%4, %c0_2] : memref<4x128xf32, #tpu.memory_space<vmem>>, vector<1x128xf32>
    %6 = arith.truncf %3 : vector<8x1024xf32> to vector<8x1024xbf16>
    %c0_3 = arith.constant 0 : index
    %c0_4 = arith.constant 0 : index
    %7 = vector.load %arg3[%c0_3, %c0_4] : memref<1024x128xbf16, #tpu.memory_space<vmem>>, vector<1024x128xbf16>
    %cst = arith.constant dense<0.000000e+00> : vector<8x128xf32>
    %8 = tpu.matmul %6, %7, %cst {dimension_numbers = #tpu.dot_dimension_numbers<[1], [0], [0], [1], [0, 0, 1, 1], [], []>} : vector<8x1024xbf16>, vector<1024x128xbf16>, vector<8x128xf32> -> vector<8x128xf32>
    %9 = vector.broadcast %5 : vector<1x128xf32> to vector<8x128xf32>
    %10 = arith.addf %8, %9 : vector<8x128xf32>
    %11 = math.tanh %10 : vector<8x128xf32>
    %12 = arith.truncf %11 : vector<8x128xf32> to vector<8x128xbf16>
    %c0_5 = arith.constant 0 : index
    %c0_6 = arith.constant 0 : index
    %13 = vector.load %arg5[%c0_5, %c0_6] : memref<128x1024xbf16, #tpu.memory_space<vmem>>, vector<128x1024xbf16>
    %cst_7 = arith.constant dense<0.000000e+00> : vector<8x1024xf32>
    %14 = tpu.matmul %12, %13, %cst_7 {dimension_numbers = #tpu.dot_dimension_numbers<[1], [0], [0], [1], [0, 0, 1, 1], [], []>} : vector<8x128xbf16>, vector<128x1024xbf16>, vector<8x1024xf32> -> vector<8x1024xf32>
    %c0_8 = arith.constant 0 : index
    %c0_9 = arith.constant 0 : index
    %15 = vector.load %arg6[%c0_8, %c0_9] : memref<1x1024xf32, #tpu.memory_space<vmem>>, vector<1x1024xf32>
    %16 = vector.broadcast %15 : vector<1x1024xf32> to vector<8x1024xf32>
    %17 = arith.addf %14, %16 : vector<8x1024xf32>
    %c2_i32 = arith.constant 2 : i32
    %18 = arith.muli %c2_i32, %arg0 : i32
    %19 = arith.index_cast %18 : i32 to index
    %20 = memref.load %arg1[%19] : memref<8xf32, #tpu.memory_space<smem>>
    %c2_i32_10 = arith.constant 2 : i32
    %21 = arith.muli %c2_i32_10, %arg0 : i32
    %c1_i32 = arith.constant 1 : i32
    %22 = arith.addi %21, %c1_i32 : i32
    %23 = arith.index_cast %22 : i32 to index
    %24 = memref.load %arg1[%23] : memref<8xf32, #tpu.memory_space<smem>>
    %25 = vector.broadcast %20 : f32 to vector<8x1024xf32>
    %26 = arith.mulf %25, %17 : vector<8x1024xf32>
    %27 = arith.subf %3, %26 : vector<8x1024xf32>
    %28 = vector.broadcast %24 : f32 to vector<8x1024xf32>
    %29 = arith.mulf %27, %28 : vector<8x1024xf32>
    %c0_11 = arith.constant 0 : index
    %c0_12 = arith.constant 0 : index
    %30 = vector.load %arg7[%c0_11, %c0_12] : memref<8x1024xf32, #tpu.memory_space<vmem>>, vector<8x1024xf32>
    tpu.vector_store %arg7[%c0_11, %c0_12], %29 {strides = array<i32>} : memref<8x1024xf32, #tpu.memory_space<vmem>>, vector<8x1024xf32>,
    return
  }
  func.func @transform_0(%arg0: i32) -> i32 {
    %c0_i32 = arith.constant 0 : i32
    %c0_i32_0 = arith.constant 0 : i32
    return %c0_i32 : i32
  }
  func.func @transform_1(%arg0: i32) -> (i32, i32) {
    %c0_i32 = arith.constant 0 : i32
    %c0_i32_0 = arith.constant 0 : i32
    %c0_i32_1 = arith.constant 0 : i32
    return %c0_i32, %c0_i32_0 : i32, i32
  }
  func.func @transform_2(%arg0: i32) -> (i32, i32) {
    %c0_i32 = arith.constant 0 : i32
    %c0_i32_0 = arith.constant 0 : i32
    %c0_i32_1 = arith.constant 0 : i32
    return %c0_i32, %c0_i32_0 : i32, i32
  }
  func.func @transform_3(%arg0: i32) -> (i32, i32) {
    %c0_i32 = arith.constant 0 : i32
    %c0_i32_0 = arith.constant 0 : i32
    %c0_i32_1 = arith.constant 0 : i32
    return %c0_i32, %c0_i32_0 : i32, i32
  }
  func.func @transform_4(%arg0: i32) -> (i32, i32) {
    %c0_i32 = arith.constant 0 : i32
    %c0_i32_0 = arith.constant 0 : i32
    %c0_i32_1 = arith.constant 0 : i32
    return %c0_i32, %c0_i32_0 : i32, i32
  }
  func.func @transform_5(%arg0: i32) -> (i32, i32) {
    %c0_i32 = arith.constant 0 : i32
    %c0_i32_0 = arith.constant 0 : i32
    %c0_i32_1 = arith.constant 0 : i32
    return %c0_i32, %c0_i32_0 : i32, i32
  }
  func.func @transform_6(%arg0: i32) -> (i32, i32) {
    %c0_i32 = arith.constant 0 : i32
    %c0_i32_0 = arith.constant 0 : i32
    %c0_i32_1 = arith.constant 0 : i32
    return %c0_i32, %c0_i32_0 : i32, i32
  }
}

</mosaic_0001>

<bundles_post_ra>
// kernel: _euler_run.1
= control target key start
LH: loop header
LB: loop body
LE: loop exit
PB: predicated region body
PF: predicated region fallthrough
CT: control target
= control target key end

     0   :  { %11 = vsyncpa [#allocation4], 0  ;;  %s2387_s0 = inlined_call_operand.vmem [shape: f32[8], index: 0, kind: input, shape index: {}]   ;;  %s2388_s1 = inlined_call_operand.vmem [shape: f32[8,1024], index: 1, kind: input, shape index: {}, may-alias: {1,6}]   ;;  %s2389_s2 = inlined_call_operand.hbm [shape: bf16[1024,128], index: 2, kind: input, shape index: {}]   ;;  %s2390_s3 = inlined_call_operand.vmem [shape: f32[4,128], index: 3, kind: input, shape index: {}]   ;;  %s2391_s4 = inlined_call_operand.hbm [shape: bf16[128,1024], index: 4, kind: input, shape index: {}]   ;;  %s2392_s5 = inlined_call_operand.vmem [shape: f32[1,1024], index: 5, kind: input, shape index: {}]   ;;  %s2393_s6 = inlined_call_operand.vmem [shape: f32[8,1024], index: 6, kind: output, shape index: {}, may-alias: {1,6}]  }
   0x1   :  { %12 = vsyncpa [#allocation3], 0 }
   0x2   :  { %13 = vsyncpa [#allocation7], 0  ;;  %s2131_s21 = smov 0  }
   0x3 LB: > { %s184_s24 = sshll.u32 %s2387_s0, 4  ;;  %s2140_s25 = sadd.s32 4294967295, %s2086_s21   ;;  %s2086_s21 = sphi %s2131_s21, %s19_s21   ;;  %s185_s24 = int_to_ptr.vmem [resolvable:$true] %s184_s24 }
   0x4   : > { %p1658_p0 = scmp.ge.s32.totalorder %s2086_s21, 1  ;;  %p171_p1 = scmp.lt.s32.totalorder %s2086_s21, 5 }
   0x5   : > { %p1909_p3 = scmp.eq.s32.totalorder %s2140_s25, 0  ;;  %s2088_s27 = smov [#allocation5]  }
   0x6   : > { %p2146_p4 = pnand %p1658_p0, %p171_p1  ;;  %s197_s28 = sshll.u32 %s2088_s27, 4  ;;  %s2152_s28 = int_to_ptr.vmem [resolvable:$true] %s197_s28 }
   0x7   : > { %s2089_s30 = smov [#allocation6]   ;;  %s1997_s8 = scalar_lea.vmem %s185_s24, 16 }
   0x8   : > { %p1899_p5 = pneg %p2146_p4  ;;  %s213_s7 = sshll.u32 %s2089_s30, 4  ;;  %s2160_s7 = int_to_ptr.vmem [resolvable:$true] %s213_s7 }
   0x9   : > { %p1998_p7 = scmp.ne.s32.totalorder %s185_s24, %s1997_s8  ;;  %p2005_p11 = scmp.lt.s32.totalorder %s185_s24, %s185_s24 }
   0xa   : > { %p2156_p6 = pnand %p1909_p3, %p1899_p5  ;;  %p2006_p12 = scmp.lt.s32.totalorder %s1997_s8, %s1997_s8 }
   0xc   : > { %p2164_p8 = pneg %p2156_p6  ;;  %p2007_p13 = por %p2006_p12, %p2005_p11 }
   0xe   : > { %p2000_p9 = pnand %p2164_p8, %p1998_p7 }
  0x10   : > { %p2001_p10 = pneg %p2000_p9 }
  0x12   : > { %p2008_p0 = pnand %p2007_p13, %p2001_p10 }
  0x14   : > { %2011 = shalt.err (!%p2008_p0)
}
  0x15   : > { %s2090_s10 = smov [#allocation2]   ;;  %s2012_s13 = scalar_lea.hbm %s2389_s2, 8192 }
  0x16   : > { %1902 = dma.vmem_to_smem (!%p2156_p6), %s185_s24, 16, %s2090_s10, [#allocation4]  }
  0x17   : > { %p2013_p1 = scmp.ne.s32.totalorder %s2389_s2, %s2012_s13  ;;  %p2019_p9 = scmp.lt.u32.totalorder %s2012_s13, %s2389_s2 }
  0x19   : > { %p2015_p5 = pnand %p2013_p1, %p2164_p8 }
  0x1b   : > { %p2016_p7 = pneg %p2015_p5 }
  0x1d   : > { %p2021_p10 = pnand %p2019_p9, %p2016_p7 }
  0x1f   : > { %2024 = shalt.err (!%p2021_p10)
}
  0x20   : > { %s2025_s18 = scalar_lea.vmem %s2152_s28, 8192  ;;  %p2033_p0 = scmp.lt.s32.totalorder %s2152_s28, %s2152_s28 }
  0x21   : > { %p2026_p11 = scmp.ne.s32.totalorder %s2152_s28, %s2025_s18  ;;  %p2034_p2 = scmp.lt.s32.totalorder %s2025_s18, %s2025_s18 }
  0x23   : > { %p2028_p12 = pnand %p2026_p11, %p2164_p8  ;;  %p2035_p1 = por %p2034_p2, %p2033_p0 }
  0x25   : > { %p2029_p13 = pneg %p2028_p12 }
  0x27   : > { %p2036_p5 = pnand %p2035_p1, %p2029_p13 }
  0x29   : > { %2039 = shalt.err (!%p2036_p5)
}
  0x2a   : > { %s2091_s19 = smov 64   ;;  %s2092_s20 = smov 4  }
  0x2b   : > { %1905 = dma.hbm_to_vmem [thread:$0]  (!%p2156_p6), %s2389_s2, 8192, %s2152_s28, [#allocation3], %s2091_s19, %s2091_s19, %s2092_s20  }
  0x2c   : > { %s2040_s30 = scalar_lea.hbm %s2391_s4, 8192 }
  0x2d   : > { %p2041_p2 = scmp.ne.s32.totalorder %s2391_s4, %s2040_s30  ;;  %p2047_p10 = scmp.lt.u32.totalorder %s2040_s30, %s2391_s4 }
  0x2f   : > { %p2043_p7 = pnand %p2041_p2, %p2164_p8 }
  0x31   : > { %p2044_p9 = pneg %p2043_p7 }
  0x33   : > { %p2049_p11 = pnand %p2047_p10, %p2044_p9 }
  0x35   : > { %2052 = shalt.err (!%p2049_p11)
}
  0x36   : > { %s2053_s28 = scalar_lea.vmem %s2160_s7, 8192  ;;  %p2061_p1 = scmp.lt.s32.totalorder %s2160_s7, %s2160_s7 }
  0x37   : > { %p2054_p12 = scmp.ne.s32.totalorder %s2160_s7, %s2053_s28  ;;  %p2062_p5 = scmp.lt.s32.totalorder %s2053_s28, %s2053_s28 }
  0x39   : > { %p2056_p13 = pnand %p2054_p12, %p2164_p8  ;;  %p2063_p2 = por %p2062_p5, %p2061_p1 }
  0x3b   : > { %p2057_p0 = pneg %p2056_p13 }
  0x3d   : > { %p2064_p7 = pnand %p2063_p2, %p2057_p0 }
  0x3f   : > { %2067 = shalt.err (!%p2064_p7)
}
  0x40   : > { %s2093_s13 = smov 512   ;;  %s2094_s14 = smov 32  }
  0x41   : > { %1908 = dma.hbm_to_vmem [thread:$0]  (!%p2156_p6), %s2391_s4, 8192, %s2160_s7, [#allocation7], %s2093_s13, %s2093_s13, %s2094_s14  }
  0x42   : > { %232 = sbr.rel (%p2146_p4) target bundleno = 653 (0x28d), region = 44 }
  0x49   : > { %2073 = dma.done.wait (%p1909_p3), [#allocation4], 16  }
  0x4a   : > { %2075 = vsyncadd (%p1909_p3), [#allocation4], 4294967280 }
  0x4b   : > { %2077 = dma.done.wait (%p1909_p3), [#allocation3], 8192  }
  0x4c   : > { %2079 = vsyncadd (%p1909_p3), [#allocation3], 4294959104 }
  0x4d   : > { %2081 = dma.done.wait (%p1909_p3), [#allocation7], 8192  }
  0x4e   : > { %2083 = vsyncadd (%p1909_p3), [#allocation7], 4294959104 }
  0x4f   : > { %246 = sfence }
  0x50   : > { %p2397_p4 = scmp.ne.s32.totalorder %s2140_s25, 0 }
  0x51   : > { %v266_v0 = vld [vmem:[%s2388_s1] sm:$0xff] (!%p2397_p4)  ;;  %v267_v1 = vld [vmem:[%s2388_s1 + $0x8] sm:$0xff] (!%p2397_p4)  ;;  %v268_v2 = vld [vmem:[%s2388_s1 + $0x10] sm:$0xff] (!%p2397_p4) }
  0x52   : > { %265 = sbr.rel (%p2397_p4) target bundleno = 101 (0x65), region = 60  ;;  %274 = vst [vmem:[%s2393_s6] sm:$0xff] (!%p2397_p4), %v266_v0  ;;  %275 = vst [vmem:[%s2393_s6 + $0x8] sm:$0xff] (!%p2397_p4), %v267_v1 }
  0x53   : > { %276 = vst [vmem:[%s2393_s6 + $0x10] sm:$0xff] (!%p2397_p4), %v268_v2 }
  0x5a   : > { %v269_v3 = vld [vmem:[%s2388_s1 + $0x18] sm:$0xff]  ;;  %v270_v4 = vld [vmem:[%s2388_s1 + $0x20] sm:$0xff]  ;;  %v271_v5 = vld [vmem:[%s2388_s1 + $0x28] sm:$0xff] }
  0x5b   : > { %277 = vst [vmem:[%s2393_s6 + $0x18] sm:$0xff] %v269_v3  ;;  %278 = vst [vmem:[%s2393_s6 + $0x20] sm:$0xff] %v270_v4 }
  0x5c   : > { %279 = vst [vmem:[%s2393_s6 + $0x28] sm:$0xff] %v271_v5 }
  0x63   : > { %v272_v6 = vld [vmem:[%s2388_s1 + $0x30] sm:$0xff]  ;;  %v273_v7 = vld [vmem:[%s2388_s1 + $0x38] sm:$0xff] }
  0x64   : > { %280 = vst [vmem:[%s2393_s6 + $0x30] sm:$0xff] %v272_v6  ;;  %281 = vst [vmem:[%s2393_s6 + $0x38] sm:$0xff] %v273_v7 }
  0x65 PF: > { %v1931_v8 = vld [vmem:[#allocation5 + $0x40] sm:$0xff]   ;;  %v1935_v12 = vld [vmem:[#allocation5 + $0x48] sm:$0xff]   ;;  %v1939_v16 = vld [vmem:[#allocation5 + $0x50] sm:$0xff]   ;;  %s290_s19 = scalar_lea.vmem %s2390_s3, %s2140_s25  ;;  %s1796_s20 = sshll.u32 %s2140_s25, 1 }
  0x66   : > { %v1932_v9 = vld [vmem:[#allocation5 + $0xc0] sm:$0xff]   ;;  %1799 = vmatprep.subr.bf16.mxu0 %v1931_v8  ;;  %v1936_v13 = vld [vmem:[#allocation5 + $0xc8] sm:$0xff]   ;;  %v1940_v17 = vld [vmem:[#allocation5 + $0xd0] sm:$0xff]   ;;  %s1569_s22 = sld [smem:[#allocation2 + %s1796_s20]]  ;;  %s1570_s23 = sadd.s32 1, %s1796_s20 }
  0x67   : > { %v1933_v10 = vld [vmem:[#allocation5] sm:$0xff]   ;;  %1821 = vmatprep.subr.bf16.mxu1 %v1932_v9  ;;  %v1937_v14 = vld [vmem:[#allocation5 + $0x8] sm:$0xff]   ;;  %v1941_v18 = vld [vmem:[#allocation5 + $0x10] sm:$0xff]   ;;  %s1571_s30 = sld [smem:[#allocation2 + %s1570_s23]] }
  0x68   : > { %v1934_v11 = vld [vmem:[#allocation5 + $0x80] sm:$0xff]   ;;  %1800 = vmatpush3.bf16.msra.mxu0 %v1933_v10  ;;  %v1938_v15 = vld [vmem:[#allocation5 + $0x88] sm:$0xff]   ;;  %v1942_v19 = vld [vmem:[#allocation5 + $0x90] sm:$0xff]  }
  0x69   : > { %1822 = vmatpush3.bf16.msra.mxu1 %v1934_v11  ;;  %1801 = vmatprep.subr.bf16.mxu0 %v1935_v12  ;;  %v1943_v20 = vld [vmem:[#allocation5 + $0x58] sm:$0xff]   ;;  %v1947_v24 = vld [vmem:[#allocation5 + $0x60] sm:$0xff]   ;;  %v1951_v28 = vld [vmem:[#allocation5 + $0x68] sm:$0xff]  }
  0x6a   : > { %1823 = vmatprep.subr.bf16.mxu1 %v1936_v13  ;;  %v1944_v21 = vld [vmem:[#allocation5 + $0xd8] sm:$0xff]   ;;  %v1948_v25 = vld [vmem:[#allocation5 + $0xe0] sm:$0xff]   ;;  %v1952_v29 = vld [vmem:[#allocation5 + $0xe8] sm:$0xff]  }
  0x6b   : > { %v1945_v22 = vld [vmem:[#allocation5 + $0x18] sm:$0xff]   ;;  %v1949_v26 = vld [vmem:[#allocation5 + $0x20] sm:$0xff]   ;;  %v1953_v30 = vld [vmem:[#allocation5 + $0x28] sm:$0xff]  }
  0x6c   : > { %1802 = vmatpush3.bf16.msra.mxu0 %v1937_v14  ;;  %v1946_v23 = vld [vmem:[#allocation5 + $0x98] sm:$0xff]   ;;  %v1950_v27 = vld [vmem:[#allocation5 + $0xa0] sm:$0xff]   ;;  %v1954_v31 = vld [vmem:[#allocation5 + $0xa8] sm:$0xff]  }
  0x6d   : > { %1824 = vmatpush3.bf16.msra.mxu1 %v1938_v15  ;;  %1803 = vmatprep.subr.bf16.mxu0 %v1939_v16  ;;  %v1955_v32 = vld [vmem:[#allocation5 + $0x70] sm:$0xff]   ;;  %v1959_v36 = vld [vmem:[#allocation5 + $0x78] sm:$0xff]   ;;  %v2285_v40 = vld [vmem:[%s2393_s6 + $0x8] sm:$0xff] }
  0x6e   : > { %1825 = vmatprep.subr.bf16.mxu1 %v1940_v17  ;;  %v1956_v33 = vld [vmem:[#allocation5 + $0xf0] sm:$0xff]   ;;  %v1960_v37 = vld [vmem:[#allocation5 + $0xf8] sm:$0xff]   ;;  %v2295_v42 = vld [vmem:[%s2393_s6] sm:$0xff]  ;;  %v293_v43 = vpack.c.bf16 %v2285_v40, %v2285_v40 }
  0x6f   : > { %v1957_v34 = vld [vmem:[#allocation5 + $0x30] sm:$0xff]   ;;  %v1961_v38 = vld [vmem:[#allocation5 + $0x38] sm:$0xff]   ;;  %v292_v45 = vpack.c.bf16 %v2295_v42, %v2295_v42  ;;  %v1963_v48 = vld [vmem:[#allocation5 + $0x140] sm:$0xff]  }
  0x70   : > { %1804 = vmatpush3.bf16.msra.mxu0 %v1941_v18  ;;  %v1958_v35 = vld [vmem:[#allocation5 + $0xb0] sm:$0xff]   ;;  %v1962_v39 = vld [vmem:[#allocation5 + $0xb8] sm:$0xff]   ;;  %848 = vmatprep.mubr.bf16.mxu0 %v293_v43  ;;  %v1964_v49 = vld [vmem:[#allocation5 + $0x1c0] sm:$0xff]  }
  0x71   : > { %1826 = vmatpush3.bf16.msra.mxu1 %v1942_v19  ;;  %1805 = vmatprep.subr.bf16.mxu0 %v1943_v20  ;;  %v2290_v41 = vld [vmem:[%s2393_s6 + $0x18] sm:$0xff]  ;;  %v2306_v46 = vld [vmem:[%s2393_s6 + $0x10] sm:$0xff]  ;;  %v1965_v50 = vld [vmem:[#allocation5 + $0x100] sm:$0xff]  }
  0x72   : > { %1827 = vmatprep.subr.bf16.mxu1 %v1944_v21  ;;  %v295_v44 = vpack.c.bf16 %v2290_v41, %v2290_v41  ;;  %v294_v47 = vpack.c.bf16 %v2306_v46, %v2306_v46  ;;  %v1966_v51 = vld [vmem:[#allocation5 + $0x180] sm:$0xff]   ;;  %v1967_v52 = vld [vmem:[#allocation5 + $0x148] sm:$0xff]   ;;  %v1971_v56 = vld [vmem:[#allocation5 + $0x150] sm:$0xff]  }
  0x73   : > { %v1968_v53 = vld [vmem:[#allocation5 + $0x1c8] sm:$0xff]   ;;  %v1972_v57 = vld [vmem:[#allocation5 + $0x1d0] sm:$0xff]   ;;  %v1975_v60 = vld [vmem:[#allocation5 + $0x158] sm:$0xff]  }
  0x74   : > { %1806 = vmatpush3.bf16.msra.mxu0 %v1945_v22  ;;  %888 = vmatprep.mubr.bf16.mxu1 %v295_v44  ;;  %v1969_v54 = vld [vmem:[#allocation5 + $0x108] sm:$0xff]   ;;  %v1973_v58 = vld [vmem:[#allocation5 + $0x110] sm:$0xff]   ;;  %v1976_v61 = vld [vmem:[#allocation5 + $0x1d8] sm:$0xff]  }
  0x75   : > { %1828 = vmatpush3.bf16.msra.mxu1 %v1946_v23  ;;  %1807 = vmatprep.subr.bf16.mxu0 %v1947_v24  ;;  %v1970_v55 = vld [vmem:[#allocation5 + $0x188] sm:$0xff]   ;;  %v1974_v59 = vld [vmem:[#allocation5 + $0x190] sm:$0xff]   ;;  %v1977_v62 = vld [vmem:[#allocation5 + $0x118] sm:$0xff]  }
  0x76   : > { %1829 = vmatprep.subr.bf16.mxu1 %v1948_v25  ;;  %v1978_v63 = vld [vmem:[#allocation5 + $0x198] sm:$0xff]   ;;  %v1979_v0 = vld [vmem:[#allocation5 + $0x160] sm:$0xff]   ;;  %v1983_v4 = vld [vmem:[#allocation5 + $0x168] sm:$0xff]  }
  0x77   : > { %v1980_v1 = vld [vmem:[#allocation5 + $0x1e0] sm:$0xff]   ;;  %v1984_v5 = vld [vmem:[#allocation5 + $0x1e8] sm:$0xff]   ;;  %v1987_v8 = vld [vmem:[#allocation5 + $0x170] sm:$0xff]  }
  0x78   : > { %1808 = vmatpush3.bf16.msra.mxu0 %v1949_v26  ;;  %v1981_v2 = vld [vmem:[#allocation5 + $0x120] sm:$0xff]   ;;  %v1985_v6 = vld [vmem:[#allocation5 + $0x128] sm:$0xff]   ;;  %v1988_v9 = vld [vmem:[#allocation5 + $0x1f0] sm:$0xff]  }
  0x79   : > { %1830 = vmatpush3.bf16.msra.mxu1 %v1950_v27  ;;  %1809 = vmatprep.subr.bf16.mxu0 %v1951_v28  ;;  %v1982_v3 = vld [vmem:[#allocation5 + $0x1a0] sm:$0xff]   ;;  %v1986_v7 = vld [vmem:[#allocation5 + $0x1a8] sm:$0xff]   ;;  %v1989_v10 = vld [vmem:[#allocation5 + $0x130] sm:$0xff]  }
  0x7a   : > { %1831 = vmatprep.subr.bf16.mxu1 %v1952_v29  ;;  %v1990_v11 = vld [vmem:[#allocation5 + $0x1b0] sm:$0xff]   ;;  %v1991_v12 = vld [vmem:[#allocation5 + $0x178] sm:$0xff]   ;;  %v2313_v16 = vld [vmem:[%s2393_s6 + $0x28] sm:$0xff] }
  0x7b   : > { %v1992_v13 = vld [vmem:[#allocation5 + $0x1f8] sm:$0xff]   ;;  %v297_v18 = vpack.c.bf16 %v2313_v16, %v2313_v16  ;;  %v2327_v20 = vld [vmem:[%s2393_s6 + $0x20] sm:$0xff]  ;;  %v2332_v21 = vld [vmem:[%s2393_s6 + $0x30] sm:$0xff] }
  0x7c   : > { %1810 = vmatpush3.bf16.msra.mxu0 %v1953_v30  ;;  %v1993_v14 = vld [vmem:[#allocation5 + $0x138] sm:$0xff]   ;;  %v296_v22 = vpack.c.bf16 %v2327_v20, %v2327_v20  ;;  %v298_v23 = vpack.c.bf16 %v2332_v21, %v2332_v21  ;;  %v978_v24 = vld [vmem:[#allocation6] sm:$0xff]  ;;  %v979_v26 = vld [vmem:[#allocation6 + $0x8] sm:$0xff] }
  0x7d   : > { %1832 = vmatpush3.bf16.msra.mxu1 %v1954_v31  ;;  %1811 = vmatprep.subr.bf16.mxu0 %v1955_v32  ;;  %v1994_v15 = vld [vmem:[#allocation5 + $0x1b8] sm:$0xff]   ;;  %v982_v25 = vld [vmem:[#allocation6 + $0x20] sm:$0xff]  ;;  %v983_v29 = vld [vmem:[#allocation6 + $0x28] sm:$0xff] }
  0x7e   : > { %1833 = vmatprep.subr.bf16.mxu1 %v1956_v33  ;;  %v2318_v17 = vld [vmem:[%s2393_s6 + $0x38] sm:$0xff]  ;;  %v1732_v27 = vcombine.low %v978_v24, %v982_v25  ;;  %v1733_v28 = vcombine.high %v978_v24, %v982_v25  ;;  %v986_v30 = vld [vmem:[#allocation6 + $0x40] sm:$0xff]  ;;  %v1734_v32 = vcombine.low %v979_v26, %v983_v29  ;;  %v1735_v33 = vcombine.high %v979_v26, %v983_v29  ;;  %v995_v43 = vld [vmem:[#allocation6 + $0x88] sm:$0xff] }
  0x7f   : > { %v299_v19 = vpack.c.bf16 %v2318_v17, %v2318_v17  ;;  %v990_v31 = vld [vmem:[#allocation6 + $0x60] sm:$0xff]  ;;  %v999_v44 = vld [vmem:[#allocation6 + $0xa8] sm:$0xff] }
  0x80   : > { %1812 = vmatpush3.bf16.msra.mxu0 %v1957_v34  ;;  %v1741_v34 = vcombine.high %v986_v30, %v990_v31  ;;  %v1034_v24 = vld [vmem:[#allocation6 + $0x1c0] sm:$0xff]  ;;  %v1035_v26 = vld [vmem:[#allocation6 + $0x1c8] sm:$0xff] }
  0x81   : > { %1834 = vmatpush3.bf16.msra.mxu1 %v1958_v35  ;;  %1813 = vmatprep.subr.bf16.mxu0 %v1959_v36  ;;  %v987_v35 = vld [vmem:[#allocation6 + $0x48] sm:$0xff]  ;;  %v1038_v25 = vld [vmem:[#allocation6 + $0x1e0] sm:$0xff] }
  0x82   : > { %1835 = vmatprep.subr.bf16.mxu1 %v1960_v37  ;;  %v991_v36 = vld [vmem:[#allocation6 + $0x68] sm:$0xff]  ;;  %v994_v37 = vld [vmem:[#allocation6 + $0x80] sm:$0xff]  ;;  %v1788_v29 = vcombine.low %v1034_v24, %v1038_v25 }
  0x84   : > { %1814 = vmatpush3.bf16.msra.mxu0 %v1961_v38  ;;  %v1743_v38 = vcombine.high %v987_v35, %v991_v36 }
  0x85   : > { %1836 = vmatpush3.bf16.msra.mxu1 %v1962_v39  ;;  %1843 = vmatprep.subr.bf16.mxu0 %v1963_v48  ;;  %v998_v39 = vld [vmem:[#allocation6 + $0xa0] sm:$0xff] }
  0x86   : > { %1865 = vmatprep.subr.bf16.mxu1 %v1964_v49  ;;  %v1749_v48 = vcombine.high %v994_v37, %v998_v39  ;;  %v1751_v49 = vcombine.high %v995_v43, %v999_v44 }
  0x87   : > { %849 = vmatmul.mubr.bf16.vlgmr.msra.gmra.mrb[0].mxu0 %v292_v45  ;;  %v1740_v45 = vcombine.low %v986_v30, %v990_v31 }
  0x88   : > { %889 = vmatmul.mubr.bf16.vlgmr.msra.gmra.mrb[0].mxu1 %v294_v47  ;;  %1844 = vmatpush3.bf16.msra.mxu0 %v1965_v50  ;;  %v1742_v47 = vcombine.low %v987_v35, %v991_v36  ;;  %v1748_v50 = vcombine.low %v994_v37, %v998_v39  ;;  %v985_v37 = vld [vmem:[#allocation6 + $0x38] sm:$0xff] }
  0x89   : > { %1866 = vmatpush3.bf16.msra.mxu1 %v1966_v51  ;;  %1845 = vmatprep.subr.bf16.mxu0 %v1967_v52  ;;  %v1750_v51 = vcombine.low %v995_v43, %v999_v44  ;;  %v1002_v52 = vld [vmem:[#allocation6 + $0xc0] sm:$0xff] }
  0x8a   : > { %1867 = vmatprep.subr.bf16.mxu1 %v1968_v53  ;;  %928 = vmatprep.mubr.bf16.mxu0 %v297_v18  ;;  %v1006_v53 = vld [vmem:[#allocation6 + $0xe0] sm:$0xff]  ;;  %v1031_v18 = vld [vmem:[#allocation6 + $0x1a8] sm:$0xff] }
  0x8b   : > { %968 = vmatprep.mubr.bf16.mxu1 %v299_v19 }
  0x8c   : > { %1846 = vmatpush3.bf16.msra.mxu0 %v1969_v54  ;;  %v1003_v54 = vld [vmem:[#allocation6 + $0xc8] sm:$0xff] }
  0x8d   : > { %1868 = vmatpush3.bf16.msra.mxu1 %v1970_v55  ;;  %1847 = vmatprep.subr.bf16.mxu0 %v1971_v56  ;;  %v1757_v55 = vcombine.high %v1002_v52, %v1006_v53  ;;  %v1007_v56 = vld [vmem:[#allocation6 + $0xe8] sm:$0xff] }
  0x8e   : > { %1869 = vmatprep.subr.bf16.mxu1 %v1972_v57  ;;  %v1756_v57 = vcombine.low %v1002_v52, %v1006_v53 }
  0x90   : > { %1848 = vmatpush3.bf16.msra.mxu0 %v1973_v58  ;;  %v1758_v58 = vcombine.low %v1003_v54, %v1007_v56 }
  0x91   : > { %1870 = vmatpush3.bf16.msra.mxu1 %v1974_v59  ;;  %1849 = vmatprep.subr.bf16.mxu0 %v1975_v60  ;;  %v1759_v59 = vcombine.high %v1003_v54, %v1007_v56  ;;  %v1010_v60 = vld [vmem:[#allocation6 + $0x100] sm:$0xff] }
  0x92   : > { %1871 = vmatprep.subr.bf16.mxu1 %v1976_v61  ;;  %v1014_v61 = vld [vmem:[#allocation6 + $0x120] sm:$0xff] }
  0x94   : > { %1850 = vmatpush3.bf16.msra.mxu0 %v1977_v62  ;;  %v1011_v62 = vld [vmem:[#allocation6 + $0x108] sm:$0xff] }
  0x95   : > { %1872 = vmatpush3.bf16.msra.mxu1 %v1978_v63  ;;  %1851 = vmatprep.subr.bf16.mxu0 %v1979_v0  ;;  %v1765_v63 = vcombine.high %v1010_v60, %v1014_v61  ;;  %v1015_v0 = vld [vmem:[#allocation6 + $0x128] sm:$0xff] }
  0x96   : > { %1873 = vmatprep.subr.bf16.mxu1 %v1980_v1  ;;  %v1764_v1 = vcombine.low %v1010_v60, %v1014_v61 }
  0x98   : > { %1852 = vmatpush3.bf16.msra.mxu0 %v1981_v2  ;;  %v1766_v2 = vcombine.low %v1011_v62, %v1015_v0 }
  0x99   : > { %1874 = vmatpush3.bf16.msra.mxu1 %v1982_v3  ;;  %1853 = vmatprep.subr.bf16.mxu0 %v1983_v4  ;;  %v1767_v3 = vcombine.high %v1011_v62, %v1015_v0  ;;  %v1018_v4 = vld [vmem:[#allocation6 + $0x140] sm:$0xff] }
  0x9a   : > { %1875 = vmatprep.subr.bf16.mxu1 %v1984_v5  ;;  %v1022_v5 = vld [vmem:[#allocation6 + $0x160] sm:$0xff] }
  0x9c   : > { %1854 = vmatpush3.bf16.msra.mxu0 %v1985_v6  ;;  %v1019_v6 = vld [vmem:[#allocation6 + $0x148] sm:$0xff] }
  0x9d   : > { %1876 = vmatpush3.bf16.msra.mxu1 %v1986_v7  ;;  %1855 = vmatprep.subr.bf16.mxu0 %v1987_v8  ;;  %v1773_v7 = vcombine.high %v1018_v4, %v1022_v5  ;;  %v1023_v8 = vld [vmem:[#allocation6 + $0x168] sm:$0xff] }
  0x9e   : > { %1877 = vmatprep.subr.bf16.mxu1 %v1988_v9  ;;  %v1772_v9 = vcombine.low %v1018_v4, %v1022_v5 }
  0xa0   : > { %1856 = vmatpush3.bf16.msra.mxu0 %v1989_v10  ;;  %v1774_v10 = vcombine.low %v1019_v6, %v1023_v8 }
  0xa1   : > { %1878 = vmatpush3.bf16.msra.mxu1 %v1990_v11  ;;  %1857 = vmatprep.subr.bf16.mxu0 %v1991_v12  ;;  %v1775_v11 = vcombine.high %v1019_v6, %v1023_v8  ;;  %v1026_v12 = vld [vmem:[#allocation6 + $0x180] sm:$0xff]  ;;  %v988_v6 = vld [vmem:[#allocation6 + $0x50] sm:$0xff]  ;;  %v989_v8 = vld [vmem:[#allocation6 + $0x58] sm:$0xff] }
  0xa2   : > { %1879 = vmatprep.subr.bf16.mxu1 %v1992_v13  ;;  %v1030_v13 = vld [vmem:[#allocation6 + $0x1a0] sm:$0xff] }
  0xa3   : > { %v1780_v19 = vcombine.low %v1026_v12, %v1030_v13 }
  0xa4   : > { %1858 = vmatpush3.bf16.msra.mxu0 %v1993_v14  ;;  %v1027_v14 = vld [vmem:[#allocation6 + $0x188] sm:$0xff] }
  0xa5   : > { %1880 = vmatpush3.bf16.msra.mxu1 %v1994_v15  ;;  %1404 = vmatprep.subr.bf16.mxu0 %v1733_v28  ;;  %v1781_v15 = vcombine.high %v1026_v12, %v1030_v13  ;;  %v1039_v28 = vld [vmem:[#allocation6 + $0x1e8] sm:$0xff] }
  0xa6   : > { %1445 = vmatprep.subr.bf16.mxu1 %v1735_v33  ;;  %v1790_v30 = vcombine.low %v1035_v26, %v1039_v28  ;;  %v1791_v31 = vcombine.high %v1035_v26, %v1039_v28  ;;  %v984_v33 = vld [vmem:[#allocation6 + $0x30] sm:$0xff]  ;;  %v1005_v28 = vld [vmem:[#allocation6 + $0xd8] sm:$0xff] }
  0xa7   : > { %929 = vmatmul.mubr.bf16.vlgmr.msra.gmra.mrb[4].mxu0 %v296_v22  ;;  %v1782_v22 = vcombine.low %v1027_v14, %v1031_v18  ;;  %v1004_v26 = vld [vmem:[#allocation6 + $0xd0] sm:$0xff] }
  0xa8   : > { %969 = vmatmul.mubr.bf16.vlgmr.msra.gmra.mrb[4].mxu1 %v298_v23  ;;  %1405 = vmatpush1.bf16.msra.mxu0 %v1732_v27  ;;  %v1783_v23 = vcombine.high %v1027_v14, %v1031_v18  ;;  %v1789_v27 = vcombine.high %v1034_v24, %v1038_v25  ;;  %v996_v14 = vld [vmem:[#allocation6 + $0x90] sm:$0xff]  ;;  %v997_v18 = vld [vmem:[#allocation6 + $0x98] sm:$0xff] }
  0xa9   : > { %1446 = vmatpush1.bf16.msra.mxu1 %v1734_v32  ;;  %1406 = vmatprep.subr.bf16.mxu0 %v1741_v34  ;;  %v980_v32 = vld [vmem:[#allocation6 + $0x10] sm:$0xff]  ;;  %v981_v34 = vld [vmem:[#allocation6 + $0x18] sm:$0xff] }
  0xaa   : > { %1447 = vmatprep.subr.bf16.mxu1 %v1743_v38  ;;  %v1736_v35 = vcombine.low %v980_v32, %v984_v33  ;;  %v1737_v36 = vcombine.high %v980_v32, %v984_v33  ;;  %v2095_v38 = vmov 0   ;;  %v1738_v39 = vcombine.low %v981_v34, %v985_v37 }
  0xab   : > { %1436 = vmatprep.mubr.bf16.mxu0 %v2095_v38  ;;  %1477 = vmatprep.mubr.bf16.mxu1 %v2095_v38  ;;  %v1739_v43 = vcombine.high %v981_v34, %v985_v37  ;;  %v1012_v34 = vld [vmem:[#allocation6 + $0x110] sm:$0xff]  ;;  %v1017_v37 = vld [vmem:[#allocation6 + $0x138] sm:$0xff] }
  0xac   : > { %1407 = vmatpush1.bf16.msra.mxu0 %v1740_v45 }
  0xad   : > { %1448 = vmatpush1.bf16.msra.mxu1 %v1742_v47  ;;  %1408 = vmatprep.subr.bf16.mxu0 %v1749_v48  ;;  %v1667_v47 = vld [vmem:[%s290_s19] ss:$0 sm:$0xff] }
  0xae   : > { %1449 = vmatprep.subr.bf16.mxu1 %v1751_v49 }
  0xb0   : > { %1409 = vmatpush1.bf16.msra.mxu0 %v1748_v50 }
  0xb1   : > { %1450 = vmatpush1.bf16.msra.mxu1 %v1750_v51  ;;  %1410 = vmatprep.subr.bf16.mxu0 %v1757_v55 }
  0xb2   : > { %1451 = vmatprep.subr.bf16.mxu1 %v1759_v59 }
  0xb4   : > { %1411 = vmatpush1.bf16.msra.mxu0 %v1756_v57 }
  0xb5   : > { %1452 = vmatpush1.bf16.msra.mxu1 %v1758_v58  ;;  %1412 = vmatprep.subr.bf16.mxu0 %v1765_v63 }
  0xb6   : > { %1453 = vmatprep.subr.bf16.mxu1 %v1767_v3 }
  0xb8   : > { %1413 = vmatpush1.bf16.msra.mxu0 %v1764_v1 }
  0xb9   : > { %1454 = vmatpush1.bf16.msra.mxu1 %v1766_v2  ;;  %1414 = vmatprep.subr.bf16.mxu0 %v1773_v7  ;;  %v992_v7 = vld [vmem:[#allocation6 + $0x70] sm:$0xff] }
  0xba   : > { %1455 = vmatprep.subr.bf16.mxu1 %v1775_v11  ;;  %v1745_v12 = vcombine.high %v988_v6, %v992_v7 }
  0xbc   : > { %1415 = vmatpush1.bf16.msra.mxu0 %v1772_v9  ;;  %v993_v9 = vld [vmem:[#allocation6 + $0x78] sm:$0xff] }
  0xbd   : > { %1456 = vmatpush1.bf16.msra.mxu1 %v1774_v10  ;;  %1416 = vmatprep.subr.bf16.mxu0 %v1781_v15  ;;  %v1747_v13 = vcombine.high %v989_v8, %v993_v9  ;;  %v1000_v15 = vld [vmem:[#allocation6 + $0xb0] sm:$0xff] }
  0xbe   : > { %1457 = vmatprep.subr.bf16.mxu1 %v1783_v23  ;;  %v1746_v23 = vcombine.low %v989_v8, %v993_v9  ;;  %v1753_v24 = vcombine.high %v996_v14, %v1000_v15  ;;  %v1044_v8 = vlaneseq }
  0xc0   : > { %1417 = vmatpush1.bf16.msra.mxu0 %v1780_v19  ;;  %v1001_v19 = vld [vmem:[#allocation6 + $0xb8] sm:$0xff]  ;;  %v1045_v9 = vshrl.u32 %v1044_v8, 7 }
  0xc1   : > { %1458 = vmatpush1.bf16.msra.mxu1 %v1782_v22  ;;  %1418 = vmatprep.subr.bf16.mxu0 %v1789_v27  ;;  %v1744_v22 = vcombine.low %v988_v6, %v992_v7  ;;  %v1755_v25 = vcombine.high %v997_v18, %v1001_v19  ;;  %v1008_v27 = vld [vmem:[#allocation6 + $0xf0] sm:$0xff] }
  0xc2   : > { %1459 = vmatprep.subr.bf16.mxu1 %v1791_v31  ;;  %v1754_v31 = vcombine.low %v997_v18, %v1001_v19  ;;  %v1761_v32 = vcombine.high %v1004_v26, %v1008_v27 }
  0xc4   : > { %1419 = vmatpush1.bf16.msra.mxu0 %v1788_v29  ;;  %v1009_v29 = vld [vmem:[#allocation6 + $0xf8] sm:$0xff] }
  0xc5   : > { %1460 = vmatpush1.bf16.msra.mxu1 %v1790_v30  ;;  %1486 = vmatprep.subr.bf16.mxu0 %v1737_v36  ;;  %v1752_v30 = vcombine.low %v996_v14, %v1000_v15  ;;  %v1763_v33 = vcombine.high %v1005_v28, %v1009_v29  ;;  %v1013_v36 = vld [vmem:[#allocation6 + $0x118] sm:$0xff]  ;;  %v1050_v14 = vsub.s32 1, %v1045_v9  ;;  %v1058_v15 = vsub.s32 3, %v1045_v9 }
  0xc6   : > { %1527 = vmatprep.subr.bf16.mxu1 %v1739_v43  ;;  %v1762_v43 = vcombine.low %v1005_v28, %v1009_v29 }
 0x15a   : > { %v1815_v44 = vpop.f32.mrb[0].mxu0 }
 0x15b   : > { %v1837_v45 = vpop.f32.mrb[0].mxu1  ;;  %v1816_v48 = vpop.f32.mrb[1].mxu0 }
 0x15c   : > { %v1838_v49 = vpop.f32.mrb[1].mxu1  ;;  %v1817_v50 = vadd.f32 %v1816_v48, %v1815_v44  ;;  %v1818_v52 = vpop.f32.mrb[2].mxu0  ;;  %v1021_v48 = vld [vmem:[#allocation6 + $0x158] sm:$0xff] }
 0x15d   : > { %v1839_v51 = vadd.f32 %v1838_v49, %v1837_v45  ;;  %v1840_v53 = vpop.f32.mrb[2].mxu1  ;;  %v1819_v54 = vpop.f32.mrb[3].mxu0  ;;  %v1020_v45 = vld [vmem:[#allocation6 + $0x150] sm:$0xff]  ;;  %v1025_v49 = vld [vmem:[#allocation6 + $0x178] sm:$0xff] }
 0x15e   : > { %v1841_v55 = vpop.f32.mrb[3].mxu1  ;;  %v851_v56 = vadd.f32 %v1817_v50, %v1667_v47  ;;  %v1024_v47 = vld [vmem:[#allocation6 + $0x170] sm:$0xff]  ;;  %v1779_v53 = vcombine.high %v1021_v48, %v1025_v49 }
 0x15f   : > { %v1777_v52 = vcombine.high %v1020_v45, %v1024_v47  ;;  %v1028_v54 = vld [vmem:[#allocation6 + $0x190] sm:$0xff] }
 0x160   : > { %v891_v57 = vadd.f32 %v1839_v51, %v851_v56  ;;  %v1770_v51 = vcombine.low %v1013_v36, %v1017_v37  ;;  %v1032_v55 = vld [vmem:[#allocation6 + $0x1b0] sm:$0xff]  ;;  %v1029_v56 = vld [vmem:[#allocation6 + $0x198] sm:$0xff] }
 0x17a   : > { %v1859_v58 = vpop.f32.mrb[4].mxu0 }
 0x17b   : > { %v1881_v59 = vpop.f32.mrb[4].mxu1  ;;  %v1860_v60 = vpop.f32.mrb[5].mxu0 }
 0x17c   : > { %v1861_v61 = vadd.f32 %v1860_v60, %v1859_v58  ;;  %v1882_v62 = vpop.f32.mrb[5].mxu1  ;;  %v1862_v63 = vpop.f32.mrb[6].mxu0  ;;  %v1776_v58 = vcombine.low %v1020_v45, %v1024_v47  ;;  %v1785_v60 = vcombine.high %v1028_v54, %v1032_v55 }
 0x17d   : > { %v1883_v0 = vadd.f32 %v1882_v62, %v1881_v59  ;;  %v1884_v1 = vpop.f32.mrb[6].mxu1  ;;  %v1863_v2 = vpop.f32.mrb[7].mxu0  ;;  %v1778_v59 = vcombine.low %v1021_v48, %v1025_v49  ;;  %v1036_v62 = vld [vmem:[#allocation6 + $0x1d0] sm:$0xff] }
 0x17e   : > { %v931_v3 = vadd.f32 %v1861_v61, %v891_v57  ;;  %v1885_v4 = vpop.f32.mrb[7].mxu1  ;;  %v1033_v57 = vld [vmem:[#allocation6 + $0x1b8] sm:$0xff]  ;;  %v1040_v63 = vld [vmem:[#allocation6 + $0x1f0] sm:$0xff]  ;;  %v1784_v2 = vcombine.low %v1028_v54, %v1032_v55 }
 0x17f   : > { %v1787_v61 = vcombine.high %v1029_v56, %v1033_v57  ;;  %v1041_v1 = vld [vmem:[#allocation6 + $0x1f8] sm:$0xff]  ;;  %v1793_v4 = vcombine.high %v1036_v62, %v1040_v63  ;;  %v1792_v6 = vcombine.low %v1036_v62, %v1040_v63 }
 0x180   : > { %v971_v5 = vadd.f32 %v1883_v0, %v931_v3  ;;  %v1037_v0 = vld [vmem:[#allocation6 + $0x1d8] sm:$0xff]  ;;  %v1786_v3 = vcombine.low %v1029_v56, %v1033_v57 }
 0x181   : > { %v1794_v7 = vcombine.low %v1037_v0, %v1041_v1 }
 0x182   : > { %1995 = vtanh.f32 %v971_v5  ;;  %v1795_v5 = vcombine.high %v1037_v0, %v1041_v1 }
 0x18c   : > { %v1996_v10 = vpop.eup %1995 }
 0x18d   : > { %v2342_v11 = vpack.c.bf16 %v1996_v10, %v1996_v10  ;;  %v1046_v10 = vsub.s32 0, %v1045_v9 }
 0x18f   : > { %1437 = vmatmul.mubr.bf16.vlgmr.msra.gmra.mrb[8].mxu0 %v2342_v11  ;;  %1478 = vmatmul.mubr.bf16.vlgmr.msra.gmra.mrb[8].mxu1 %v2342_v11 }
 0x190   : > { %1487 = vmatpush1.bf16.msra.mxu0 %v1736_v35  ;;  %1528 = vmatpush1.bf16.msra.mxu1 %v1738_v39  ;;  %v1016_v35 = vld [vmem:[#allocation6 + $0x130] sm:$0xff]  ;;  %v1760_v39 = vcombine.low %v1004_v26, %v1008_v27 }
 0x191   : > { %1488 = vmatprep.subr.bf16.mxu0 %v1745_v12  ;;  %1529 = vmatprep.subr.bf16.mxu1 %v1747_v13  ;;  %v1769_v44 = vcombine.high %v1012_v34, %v1016_v35  ;;  %v1768_v50 = vcombine.low %v1012_v34, %v1016_v35  ;;  %v1054_v12 = vsub.s32 2, %v1045_v9  ;;  %v1042_v13 = vld [vmem:[%s2392_s5] sm:$0xff] }
 0x192   : > { %1518 = vmatprep.mubr.bf16.mxu0 %v2095_v38  ;;  %1559 = vmatprep.mubr.bf16.mxu1 %v2095_v38  ;;  %v1771_v38 = vcombine.high %v1013_v36, %v1017_v37  ;;  %v1047_v18 = vrot.slane %v1042_v13, %v1046_v10 }
 0x193   : > { %v1055_v19 = vrot.slane %v1042_v13, %v1054_v12 }
 0x194   : > { %1489 = vmatpush1.bf16.msra.mxu0 %v1744_v22  ;;  %1530 = vmatpush1.bf16.msra.mxu1 %v1746_v23  ;;  %v1051_v22 = vrot.slane %v1042_v13, %v1050_v14  ;;  %v1059_v23 = vrot.slane %v1042_v13, %v1058_v15 }
 0x195   : > { %1490 = vmatprep.subr.bf16.mxu0 %v1753_v24  ;;  %1531 = vmatprep.subr.bf16.mxu1 %v1755_v25 }
 0x198   : > { %1491 = vmatpush1.bf16.msra.mxu0 %v1752_v30  ;;  %1532 = vmatpush1.bf16.msra.mxu1 %v1754_v31 }
 0x199   : > { %1492 = vmatprep.subr.bf16.mxu0 %v1761_v32  ;;  %1533 = vmatprep.subr.bf16.mxu1 %v1763_v33 }
 0x19c   : > { %1493 = vmatpush1.bf16.msra.mxu0 %v1760_v39  ;;  %1534 = vmatpush1.bf16.msra.mxu1 %v1762_v43  ;;  %v1589_v39 = vstv %s1571_s30 }
 0x19d   : > { %1494 = vmatprep.subr.bf16.mxu0 %v1769_v44  ;;  %1535 = vmatprep.subr.bf16.mxu1 %v1771_v38 }
 0x1a0   : > { %1495 = vmatpush1.bf16.msra.mxu0 %v1768_v50  ;;  %1536 = vmatpush1.bf16.msra.mxu1 %v1770_v51 }
 0x1a1   : > { %1496 = vmatprep.subr.bf16.mxu0 %v1777_v52  ;;  %1537 = vmatprep.subr.bf16.mxu1 %v1779_v53 }
 0x1a4   : > { %1497 = vmatpush1.bf16.msra.mxu0 %v1776_v58  ;;  %1538 = vmatpush1.bf16.msra.mxu1 %v1778_v59 }
 0x1a5   : > { %1498 = vmatprep.subr.bf16.mxu0 %v1785_v60  ;;  %1539 = vmatprep.subr.bf16.mxu1 %v1787_v61 }
 0x1a8   : > { %1499 = vmatpush1.bf16.msra.mxu0 %v1784_v2  ;;  %1540 = vmatpush1.bf16.msra.mxu1 %v1786_v3 }
 0x1a9   : > { %1500 = vmatprep.subr.bf16.mxu0 %v1793_v4  ;;  %1541 = vmatprep.subr.bf16.mxu1 %v1795_v5 }
 0x1ac   : > { %1501 = vmatpush1.bf16.msra.mxu0 %v1792_v6  ;;  %1542 = vmatpush1.bf16.msra.mxu1 %v1794_v7 }
 0x1af   : > { %1519 = vmatmul.mubr.bf16.vlgmr.msra.gmra.mrb[12].mxu0 %v2342_v11  ;;  %1560 = vmatmul.mubr.bf16.vlgmr.msra.gmra.mrb[12].mxu1 %v2342_v11  ;;  %v1572_v11 = vstv %s1569_s22 }
 0x262   : > { %v1438_v24 = vpop.f32.mrb[8].mxu0  ;;  %v1479_v25 = vpop.f32.mrb[8].mxu1 }
 0x263   : > { %v1439_v26 = vadd.f32 %v1438_v24, %v1047_v18  ;;  %v1480_v27 = vadd.f32 %v1479_v25, %v1055_v19  ;;  %v1440_v28 = vpop.f32.mrb[9].mxu0  ;;  %v1481_v29 = vpop.f32.mrb[9].mxu1 }
 0x264   : > { %v1441_v30 = vadd.f32 %v1440_v28, %v1051_v22  ;;  %v1482_v31 = vadd.f32 %v1481_v29, %v1059_v23  ;;  %v1442_v32 = vpop.f32.mrb[10].mxu0  ;;  %v1483_v33 = vpop.f32.mrb[10].mxu1 }
 0x265   : > { %v1573_v34 = vmul.f32 %v1572_v11, %v1439_v26  ;;  %v1575_v35 = vmul.f32 %v1572_v11, %v1480_v27  ;;  %v1443_v36 = vpop.f32.mrb[11].mxu0  ;;  %v1484_v37 = vpop.f32.mrb[11].mxu1 }
 0x266   : > { %v1574_v43 = vmul.f32 %v1572_v11, %v1441_v30  ;;  %v1576_v44 = vmul.f32 %v1572_v11, %v1482_v31 }
 0x267   : > { %v1581_v38 = vsub.f32 %v2295_v42, %v1573_v34  ;;  %v1583_v45 = vsub.f32 %v2306_v46, %v1575_v35  ;;  %v1066_v42 = vsub.s32 5, %v1045_v9  ;;  %v1074_v46 = vsub.s32 7, %v1045_v9 }
 0x268   : > { %v1582_v47 = vsub.f32 %v2285_v40, %v1574_v43  ;;  %v1584_v48 = vsub.f32 %v2290_v41, %v1576_v44  ;;  %v1062_v40 = vsub.s32 4, %v1045_v9  ;;  %v1070_v41 = vsub.s32 6, %v1045_v9 }
 0x269   : > { %v1590_v49 = vmul.f32 %v1589_v39, %v1581_v38  ;;  %v1592_v50 = vmul.f32 %v1589_v39, %v1583_v45  ;;  %v1067_v55 = vrot.slane %v1042_v13, %v1066_v42  ;;  %v1075_v56 = vrot.slane %v1042_v13, %v1074_v46 }
 0x26a   : > { %v1591_v51 = vmul.f32 %v1589_v39, %v1582_v47  ;;  %v1593_v52 = vmul.f32 %v1589_v39, %v1584_v48  ;;  %v1063_v53 = vrot.slane %v1042_v13, %v1062_v40  ;;  %v1071_v54 = vrot.slane %v1042_v13, %v1070_v41 }
 0x26b   : > { %1598 = vst [vmem:[%s2393_s6] sm:$0xff] %v1590_v49  ;;  %1600 = vst [vmem:[%s2393_s6 + $0x10] sm:$0xff] %v1592_v50 }
 0x26c   : > { %1599 = vst [vmem:[%s2393_s6 + $0x8] sm:$0xff] %v1591_v51  ;;  %1601 = vst [vmem:[%s2393_s6 + $0x18] sm:$0xff] %v1593_v52 }
 0x282   : > { %v1520_v57 = vpop.f32.mrb[12].mxu0  ;;  %v1561_v58 = vpop.f32.mrb[12].mxu1 }
 0x283   : > { %v1521_v59 = vadd.f32 %v1520_v57, %v1063_v53  ;;  %v1562_v60 = vadd.f32 %v1561_v58, %v1071_v54  ;;  %v1522_v61 = vpop.f32.mrb[13].mxu0  ;;  %v1563_v62 = vpop.f32.mrb[13].mxu1 }
 0x284   : > { %v1523_v63 = vadd.f32 %v1522_v61, %v1067_v55  ;;  %v1564_v0 = vadd.f32 %v1563_v62, %v1075_v56  ;;  %v1524_v1 = vpop.f32.mrb[14].mxu0  ;;  %v1565_v2 = vpop.f32.mrb[14].mxu1 }
 0x285   : > { %v1577_v3 = vmul.f32 %v1572_v11, %v1521_v59  ;;  %v1579_v4 = vmul.f32 %v1572_v11, %v1562_v60  ;;  %v1525_v5 = vpop.f32.mrb[15].mxu0  ;;  %v1566_v6 = vpop.f32.mrb[15].mxu1 }
 0x286   : > { %v1578_v7 = vmul.f32 %v1572_v11, %v1523_v63  ;;  %v1580_v8 = vmul.f32 %v1572_v11, %v1564_v0 }
 0x287   : > { %v1585_v9 = vsub.f32 %v2327_v20, %v1577_v3  ;;  %v1587_v10 = vsub.f32 %v2332_v21, %v1579_v4 }
 0x288   : > { %v1586_v12 = vsub.f32 %v2313_v16, %v1578_v7  ;;  %v1588_v13 = vsub.f32 %v2318_v17, %v1580_v8 }
 0x289   : > { %v1594_v14 = vmul.f32 %v1589_v39, %v1585_v9  ;;  %v1596_v15 = vmul.f32 %v1589_v39, %v1587_v10 }
 0x28a   : > { %v1595_v18 = vmul.f32 %v1589_v39, %v1586_v12  ;;  %v1597_v19 = vmul.f32 %v1589_v39, %v1588_v13 }
 0x28b   : > { %1602 = vst [vmem:[%s2393_s6 + $0x20] sm:$0xff] %v1594_v14  ;;  %1604 = vst [vmem:[%s2393_s6 + $0x30] sm:$0xff] %v1596_v15 }
 0x28c   : > { %1603 = vst [vmem:[%s2393_s6 + $0x28] sm:$0xff] %v1595_v18  ;;  %1605 = vst [vmem:[%s2393_s6 + $0x38] sm:$0xff] %v1597_v19 }
 0x28d PF: > { %s19_s21 = sadd.s32 1, %s2086_s21  }
 0x28e   : > { %p16_p3 = scmp.ge.s32.totalorder %s19_s21, 6  }
 0x290   :  { %18 = sbr.rel (!%p16_p3) target bundleno = 3 (0x3), region = 86 }
 0x297   :  { %1617 = vsyncpa [#allocation3], 1 }
 0x298   :  { %1619 = vsyncpa [#allocation3 + $0x1], 1 }
 0x299   :  { %1620 = vsyncpa [#allocation7], 1 }
 0x29a   :  { %1621 = vsyncpa [#allocation4], 1 }
 0x29b   :  { %1623 = vsyncpa [#allocation4 + $0x1], 1 }

</bundles_post_ra>
